<compile_context>
chip_gen: v5e
topology: v5e:2x2
jax: 0.10.0
libtpu: 0.0.40
codegen_flags: <defaults>
</compile_context>

<pallas_src>
import jax
import jax.numpy as jnp
from jax.experimental import pallas as pl
from jax.experimental.pallas import tpu as pltpu

PAD = 0
B = 2             # batch
S = 32            # sequence length (>= 8*PACK so per-sequence blocks are (8,128)-tiled)
E = 32            # args.emsize
V = 64            # args.vocab_size (toy; see TODO for realistic vocab)
MAX_SRC_LEN = 64  # args.max_src_len (>= S)


def embedder_encoder_kernel(ids_ref, wbd_ref, pos_ref, out_ref):
    """One grid step = one sequence's packed rows.

    ids_ref : (rows, PACK*V) int32  -- token ids lane-repeated with +j*V block offsets
    wbd_ref : (PACK*V, PACK*E) bf16 -- block-diagonal word-embedding slab (full table)
    pos_ref : (rows, PACK*E) f32    -- per-sequence lane-dense positional slab
    out_ref : (rows, PACK*E) f32    -- lane-dense output slab (128-lane rows)
    """
    rows, kdim = ids_ref.shape

    # One-hot over the fused K axis: single VPU compare + cast (ids already
    # carry the +j*V block offset, so a plain lane iota is the compare target).
    lane_iota = jax.lax.broadcasted_iota(jnp.int32, (rows, kdim), 1)
    onehot = (ids_ref[...] == lane_iota).astype(wbd_ref.dtype)      # bf16 0/1

    # Single MXU matmul (K = PACK*V = 256 fills the v6e/v7x MXU in one pass),
    # f32 accumulation -> result is exactly the bf16-rounded embedding rows.
    # Note: out-of-range ids (<0 or >= V) match nothing -> all-zero row,
    # whereas nn.Embedding would error; callers must pass valid ids.
    # TODO(synk): for realistic vocab sizes replace the resident-table one-hot
    # matmul with a row gather: scalar-prefetch ids into SMEM
    # (PrefetchScalarGridSpec num_scalar_prefetch=1), keep word_emb in HBM via
    # BlockSpec(memory_space=pl.ANY), and double-buffer pltpu.make_async_copy
    # row fetches — mandatory earliest on v7x (64 MiB VMEM) / v5e (weak MXU).
    word = jnp.dot(onehot, wbd_ref[...], preferred_element_type=jnp.float32)

    # Positional add in f32 on the VPU (free filler under the MXU); one
    # unmasked 128-lane-wide store.
    out_ref[...] = word + pos_ref[...]
    # TODO(synk): nn.Dropout(args.dropout_emb) is identity in eval mode; training
    # dropout (pltpu.prng_random_bits mask) intentionally not applied.


def embedder_forward(tokens, word_emb, pos_emb):
    """Encoder-mode forward of the Embedder module.

    tokens   : (B, S) int32
    word_emb : (V, E) float32   (row PAD must be zero: nn.Embedding padding_idx)
    pos_emb  : (MAX_SRC_LEN, E) float32
    returns  : (B, S, E) float32
    """
    b, s = tokens.shape
    v, e = word_emb.shape

    if e % 128 == 0:
        pack = 1                       # output rows already lane-dense
    else:
        assert 128 % e == 0, "E must divide 128 (or be a multiple of 128)"
        pack = 128 // e
    assert s % pack == 0, "S must be a multiple of the lane-packing factor"
    lane = pack * e                    # output lane width (multiple of 128)
    s_pack = s // pack                 # packed rows per sequence
    assert s_pack % 8 == 0, "need >=8 packed rows/seq for (8,128) block tiling"
    g = b * s_pack                     # total packed rows

    # --- wrapper-side layout plumbing (no compute hoisting) ------------------
    # ids slab: ids_off[r, j*V + k] = tokens_flat[r*PACK + j] + j*V
    ids_packed = tokens.reshape(g, pack).astype(jnp.int32)
    offs = jnp.arange(pack, dtype=jnp.int32) * v
    ids_off = jnp.repeat(ids_packed + offs[None, :], v, axis=1)     # (G, PACK*V)

    # block-diagonal weight slab (built once), bf16 for the MXU fast path
    wbd = jnp.zeros((pack * v, lane), dtype=word_emb.dtype)
    for j in range(pack):
        wbd = wbd.at[j * v:(j + 1) * v, j * e:(j + 1) * e].set(word_emb)
    wbd = wbd.astype(jnp.bfloat16)

    # per-sequence lane-dense positional slab — NOT tiled over batch
    pos_packed = pos_emb[:s].reshape(s_pack, lane)                  # (S_pack, lane) f32

    grid_spec = pltpu.PrefetchScalarGridSpec(
        num_scalar_prefetch=0,
        grid=(b,),  # one step per sequence; scale to multi-sequence row tiles
                    # (>=512 rows) when B*S grows beyond toy size.
        in_specs=[
            pl.BlockSpec((s_pack, pack * v), lambda i: (i, 0)),
            pl.BlockSpec((pack * v, lane), lambda i: (0, 0)),   # full table, revisited
            pl.BlockSpec((s_pack, lane), lambda i: (0, 0)),     # pos replayed across batch
        ],
        out_specs=pl.BlockSpec((s_pack, lane), lambda i: (i, 0)),
    )

    out_dense = pl.pallas_call(
        embedder_encoder_kernel,
        out_shape=jax.ShapeDtypeStruct((g, lane), jnp.float32),
        grid_spec=grid_spec,
        # Batch axis is independent -> megacore-shardable on v7x (2 TCs/chip).
        # TODO(synk): set vmem_limit_bytes explicitly once table/tile sizes grow
        # (inputs are double-buffered; v7x only has 64 MiB VMEM).
        compiler_params=pltpu.CompilerParams(
            dimension_semantics=("parallel",)),
    )(ids_off, wbd, pos_packed)

    # out_dense is the row-major flattening of (B, S, E); reshape is pure layout.
    return out_dense.reshape(b, s, e)


def reference_forward(tokens, word_emb, pos_emb):
    word = word_emb[tokens]                                   # (B, S, E)
    pos = pos_emb[jnp.arange(tokens.shape[1])][None, :, :]    # (1, S, E)
    return word + pos


if __name__ == "__main__":
    key = jax.random.PRNGKey(0)
    k_tok, k_wemb, k_pemb = jax.random.split(key, 3)

    # Deterministic parameter init (synthetic, no checkpoint load).
    word_emb = 0.02 * jax.random.normal(k_wemb, (V, E), dtype=jnp.float32)
    word_emb = word_emb.at[PAD].set(0.0)   # nn.Embedding padding_idx=PAD -> zero row
    pos_emb = 0.02 * jax.random.normal(k_pemb, (MAX_SRC_LEN, E), dtype=jnp.float32)

    # Token ids in [0, V), with a couple of PAD tokens at the end of each row.
    tokens = jax.random.randint(k_tok, (B, S), 0, V, dtype=jnp.int32)
    tokens = tokens.at[:, -2:].set(PAD)

    out = embedder_forward(tokens, word_emb, pos_emb)
    out = jax.block_until_ready(out)
    assert out.shape == (B, S, E)

    # The kernel's table operand is bf16 (MXU fast path, f32 accumulate), so it
    # matches a gather from the bf16-rounded table essentially exactly ...
    ref_bf16 = reference_forward(
        tokens, word_emb.astype(jnp.bfloat16).astype(jnp.float32), pos_emb)
    assert jnp.allclose(out, ref_bf16, atol=1e-6, rtol=1e-6)
    # ... and the pure-f32 reference to within bf16 operand rounding.
    ref_f32 = reference_forward(tokens, word_emb, pos_emb)
    assert jnp.allclose(out, ref_f32, atol=1e-3, rtol=1e-2)

    print("KERNEL_OK")
</pallas_src>

<mosaic_0001>
module attributes {stable_mosaic.version = 11 : i64} {
  func.func @embedder_encoder_kernel(%arg0: i32, %arg1: memref<8x256xi32, #tpu.memory_space<vmem>>, %arg2: memref<256x128xbf16, #tpu.memory_space<vmem>>, %arg3: memref<8x128xf32, #tpu.memory_space<vmem>>, %arg4: memref<8x128xf32, #tpu.memory_space<vmem>>) attributes {dimension_semantics = [#tpu.dimension_semantics<parallel>], iteration_bounds = array<i64: 2>, scalar_prefetch = 0 : i64, scratch_operands = 0 : i64, tpu.core_type = #tpu.core_type<tc>, window_params = [{transform_indices = @transform_0, window_bounds = array<i64: 8, 256>}, {pipeline_mode = #tpu.pipeline_mode<synchronous>, transform_indices = @transform_1, window_bounds = array<i64: 256, 128>}, {pipeline_mode = #tpu.pipeline_mode<synchronous>, transform_indices = @transform_2, window_bounds = array<i64: 8, 128>}, {transform_indices = @transform_3, window_bounds = array<i64: 8, 128>}]} {
    %0 = tpu.iota {dimensions = array<i32: 1>} : vector<8x256xi32>
    %c0 = arith.constant 0 : index
    %c0_0 = arith.constant 0 : index
    %1 = vector.load %arg1[%c0, %c0_0] : memref<8x256xi32, #tpu.memory_space<vmem>>, vector<8x256xi32>
    %2 = arith.cmpi eq, %1, %0 : vector<8x256xi32>
    %3 = arith.extui %2 : vector<8x256xi1> to vector<8x256xi32>
    %4 = arith.sitofp %3 : vector<8x256xi32> to vector<8x256xf32>
    %5 = arith.truncf %4 : vector<8x256xf32> to vector<8x256xbf16>
    %c0_1 = arith.constant 0 : index
    %c0_2 = arith.constant 0 : index
    %6 = vector.load %arg2[%c0_1, %c0_2] : memref<256x128xbf16, #tpu.memory_space<vmem>>, vector<256x128xbf16>
    %cst = arith.constant dense<0.000000e+00> : vector<8x128xf32>
    %7 = tpu.matmul %5, %6, %cst {dimension_numbers = #tpu.dot_dimension_numbers<[1], [0], [0], [1], [0, 0, 1, 1], [], []>} : vector<8x256xbf16>, vector<256x128xbf16>, vector<8x128xf32> -> vector<8x128xf32>
    %c0_3 = arith.constant 0 : index
    %c0_4 = arith.constant 0 : index
    %8 = vector.load %arg3[%c0_3, %c0_4] : memref<8x128xf32, #tpu.memory_space<vmem>>, vector<8x128xf32>
    %9 = arith.addf %7, %8 : vector<8x128xf32>
    %c0_5 = arith.constant 0 : index
    %c0_6 = arith.constant 0 : index
    %10 = vector.load %arg4[%c0_5, %c0_6] : memref<8x128xf32, #tpu.memory_space<vmem>>, vector<8x128xf32>
    tpu.vector_store %arg4[%c0_5, %c0_6], %9 {strides = array<i32>} : memref<8x128xf32, #tpu.memory_space<vmem>>, vector<8x128xf32>,
    return
  }
  func.func @transform_0(%arg0: i32) -> (i32, i32) {
    %c0_i32 = arith.constant 0 : i32
    %c0_i32_0 = arith.constant 0 : i32
    return %arg0, %c0_i32 : i32, i32
  }
  func.func @transform_1(%arg0: i32) -> (i32, i32) {
    %c0_i32 = arith.constant 0 : i32
    %c0_i32_0 = arith.constant 0 : i32
    %c0_i32_1 = arith.constant 0 : i32
    return %c0_i32, %c0_i32_0 : i32, i32
  }
  func.func @transform_2(%arg0: i32) -> (i32, i32) {
    %c0_i32 = arith.constant 0 : i32
    %c0_i32_0 = arith.constant 0 : i32
    %c0_i32_1 = arith.constant 0 : i32
    return %c0_i32, %c0_i32_0 : i32, i32
  }
  func.func @transform_3(%arg0: i32) -> (i32, i32) {
    %c0_i32 = arith.constant 0 : i32
    %c0_i32_0 = arith.constant 0 : i32
    return %arg0, %c0_i32 : i32, i32
  }
}

</mosaic_0001>

<bundles_post_ra>
// kernel: tpu_custom_call.1
= control target key start
LH: loop header
LB: loop body
LE: loop exit
PB: predicated region body
PF: predicated region fallthrough
CT: control target
= control target key end

     0   :  { %8 = vsyncpa [#allocation3], 0  ;;  %s1005_s0 = inlined_call_operand.hbm [shape: s32[16,256], index: 0, kind: input, shape index: {}]   ;;  %s1006_s1 = inlined_call_operand.hbm [shape: bf16[256,128], index: 1, kind: input, shape index: {}]   ;;  %s1007_s2 = inlined_call_operand.hbm [shape: f32[8,128], index: 2, kind: input, shape index: {}]   ;;  %s1008_s3 = inlined_call_operand.hbm [shape: f32[16,128], index: 3, kind: output, shape index: {}]  }
   0x1   :  { %10 = vsyncpa [#allocation3 + $0x1], 0 }
   0x2   :  { %11 = vsyncpa [#allocation6], 0 }
   0x3   :  { %12 = vsyncpa [#allocation4], 0 }
   0x4   :  { %14 = vsyncpa [#allocation4 + $0x1], 0  ;;  %s855_s12 = smov 0   ;;  %s857_s13 = smov 0  }
   0x5   :  { %s859_s14 = smov 0   ;;  %s861_s15 = smov 0  }
   0x6 LB: > { %s130_s18 = sshll.u32 %s1006_s1, 4  ;;  %s879_s19 = sadd.s32 4294967295, %s828_s15   ;;  %s828_s15 = sphi %s861_s15, %s1019_s15   ;;  %s824_s14 = sphi %s859_s14, %s1018_s14   ;;  %s820_s13 = sphi %s857_s13, %s1017_s13   ;;  %s816_s12 = sphi %s855_s12, %s1016_s12   ;;  %s131_s18 = int_to_ptr.hbm [resolvable:$true] %s130_s18 }
   0x7   : > { %p495_p0 = scmp.ge.s32.totalorder %s828_s15, 1  ;;  %p41_p1 = scmp.eq.s32.totalorder %s879_s19, 0 }
   0x8   : > { %p119_p2 = scmp.lt.s32.totalorder %s828_s15, 3  ;;  %s830_s21 = smov [#allocation5]  }
   0x9   : > { %s132_s22 = sshll.u32 %s830_s21, 4  ;;  %s145_s25 = sshll.u32 %s1007_s2, 4  ;;  %s133_s22 = int_to_ptr.vmem [resolvable:$true] %s132_s22  ;;  %s146_s25 = int_to_ptr.hbm [resolvable:$true] %s145_s25 }
   0xa   : > { %p884_p3 = pnand %p495_p0, %p119_p2  ;;  %s831_s26 = smov [#allocation7]  }
   0xb   : > { %s147_s27 = sshll.u32 %s831_s26, 4  ;;  %s832_s28 = smov 64   ;;  %s148_s27 = int_to_ptr.vmem [resolvable:$true] %s147_s27 }
   0xc   : > { %p610_p4 = pneg %p884_p3  ;;  %s833_s29 = smov 4  }
   0xd   : > { %s494_s30 = sadd.s32 4294967294, %s828_s15   ;;  %s898_s4 = sadd.s32 1, %s828_s15  }
   0xe   : > { %p611_p6 = pnand %p610_p4, %p41_p1  ;;  %s24_s5 = ssub.s32 %s828_s15, %s898_s4 }
   0xf   : > { %s27_s6 = sadd.s32 1, %s824_s14  ;;  %p25_p7 = scmp.eq.s32.totalorder %s24_s5, 0 }
  0x10   : > { %613 = dma.hbm_to_vmem [thread:$0]  (!%p611_p6), %s131_s18, 2048, %s133_s22, [#allocation6], %s832_s28, %s832_s28, %s833_s29  }
  0x11   : > { %616 = dma.hbm_to_vmem [thread:$0]  (!%p611_p6), %s146_s25, 128, %s148_s27, [#allocation6]  }
  0x12   : > { %p34_p8 = scmp.ne.s32.totalorder %s824_s14, %s820_s13  ;;  %p35_p9 = scmp.eq.s32.totalorder %s828_s15, 0 }
  0x13   : > { %p40_p10 = scmp.ne.s32.totalorder %s820_s13, %s816_s12  ;;  %p106_p13 = scmp.eq.s32.totalorder %s879_s19, 1 }
  0x14   : > { %s909_s7 = scalar_select %p25_p7, %s824_s14, %s27_s6  }
  0x15   : > { %p911_p11 = por %p35_p9, %p34_p8  ;;  %p917_p12 = por %p41_p1, %p40_p10 }
  0x16   : > { %p112_p0 = scmp.eq.s32.totalorder %s494_s30, 1  ;;  %p627_p2 = scmp.lt.s32.totalorder %s828_s15, 2 }
  0x17   : > { %s158_s10 = sand.u32 1, %s824_s14   ;;  %p924_p4 = por %p106_p13, %p34_p8 }
  0x18   : > { %p928_p6 = por %p112_p0, %p40_p10  ;;  %s499_s17 = sshll.u32 %s158_s10, 4 }
  0x19   : > { %s581_s18 = sshll.u32 %s828_s15, 4  ;;  %s162_s24 = scalar_lea.vmem [#allocation2], %s499_s17 }
  0x1a   : > { %s167_s23 = scalar_lea.hbm %s1005_s0, %s581_s18  ;;  %s171_s25 = sshll.u32 %s162_s24, 4  ;;  %s172_s25 = int_to_ptr.vmem [resolvable:$true] %s171_s25 }
  0x1b   : > { %s169_s26 = sshll.u32 %s167_s23, 4  ;;  %p938_p7 = pnand %p627_p2, %p911_p11  ;;  %s170_s26 = int_to_ptr.hbm [resolvable:$true] %s169_s26 }
  0x1c   : > { %s159_s28 = scalar_lea.sflag [#allocation3], %s158_s10  ;;  %s728_s29 = sshra.s32 %s170_s26, 4  ;;  %s729_s29 = int_to_ptr.hbm [resolvable:$true] %s728_s29 }
  0x1d   : > { %s730_s30 = scalar_lea.hbm %s729_s29, 16  ;;  %p732_p9 = pneg %p938_p7 }
  0x1e   : > { %p731_p8 = scmp.ne.s32.totalorder %s729_s29, %s730_s30  ;;  %s735_s17 = scalar_lea.hbm %s1005_s0, 32 }
  0x1f   : > { %p736_p11 = scmp.lt.s32.totalorder %s729_s29, %s1005_s0  ;;  %p737_p0 = scmp.lt.s32.totalorder %s735_s17, %s730_s30 }
  0x20   : > { %p733_p10 = pnand %p732_p9, %p731_p8 }
  0x21   : > { %p738_p2 = por %p737_p0, %p736_p11 }
  0x22   : > { %p734_p13 = pneg %p733_p10 }
  0x24   : > { %p739_p5 = pnand %p738_p2, %p734_p13 }
  0x26   : > { %742 = shalt.err (!%p739_p5)
}
  0x27   : > { %620 = dma.hbm_to_vmem [thread:$0]  (!%p938_p7), %s170_s26, 256, %s172_s25, %s159_s28  }
  0x28   : > { %180 = sbr.rel (%p884_p3) target bundleno = 215 (0xd7), region = 32  ;;  %s955_s10 = sand.u32 (!%p884_p3), 1, %s820_s13  }
  0x29   : > { %s503_s21 = sshll.u32 (!%p884_p3), %s955_s10, 4  ;;  %s183_s22 = scalar_lea.sflag (!%p884_p3), [#allocation3], %s955_s10 }
  0x2a   : > { %s959_s23 = scalar_lea.vmem (!%p884_p3), [#allocation2], %s503_s21 }
  0x2d   : > { %803 = dma.done.wait (%p917_p12), %s183_s22, 256  }
  0x2e   : > { %805 = vsyncadd (%p917_p12), %s183_s22, 4294967040 }
  0x2f   : > { %807 = dma.done.wait (%p41_p1), [#allocation6], 2176  }
  0x30   : > { %809 = vsyncadd (%p41_p1), [#allocation6], 4294965120  ;;  %v589_v0 = vld [vmem:[#allocation5 + $0x38] sm:$0xff]  ;;  %v588_v2 = vld [vmem:[#allocation5 + $0x30] sm:$0xff]  ;;  %v220_v10 = vlaneseq  ;;  %v834_v21 = vmov 1.0|1.0  }
  0x31   : > { %v597_v1 = vld [vmem:[#allocation5 + $0x78] sm:$0xff]  ;;  %362 = vmatpush.bf16.msra.mxu0 %v589_v0  ;;  %v596_v3 = vld [vmem:[#allocation5 + $0x70] sm:$0xff]  ;;  %v587_v4 = vld [vmem:[#allocation5 + $0x28] sm:$0xff]  ;;  %s506_s20 = sshll.u32 %s955_s10, 3  ;;  %s578_s9 = sshll.u32 %s879_s19, 3 }
  0x32   : > { %375 = vmatpush.bf16.msra.mxu1 %v597_v1  ;;  %v595_v5 = vld [vmem:[#allocation5 + $0x68] sm:$0xff]  ;;  %v586_v6 = vld [vmem:[#allocation5 + $0x20] sm:$0xff]  ;;  %v585_v8 = vld [vmem:[#allocation5 + $0x18] sm:$0xff]  ;;  %v221_v13 = vand.u32 127, %v220_v10  ;;  %s400_s26 = scalar_lea.hbm %s1008_s3, %s578_s9  ;;  %s219_s27 = scalar_lea.vmem [#allocation8], %s506_s20 }
  0x33   : > { %v594_v7 = vld [vmem:[#allocation5 + $0x60] sm:$0xff]  ;;  %v593_v9 = vld [vmem:[#allocation5 + $0x58] sm:$0xff]  ;;  %v584_v11 = vld [vmem:[#allocation5 + $0x10] sm:$0xff]  ;;  %s402_s28 = sshll.u32 %s219_s27, 4  ;;  %s404_s29 = sshll.u32 %s400_s26, 4  ;;  %s403_s28 = int_to_ptr.vmem [resolvable:$true] %s402_s28  ;;  %s405_s29 = int_to_ptr.hbm [resolvable:$true] %s404_s29 }
  0x34   : > { %v592_v12 = vld [vmem:[#allocation5 + $0x50] sm:$0xff]  ;;  %v583_v14 = vld [vmem:[#allocation5 + $0x8] sm:$0xff]  ;;  %v222_v17 = vadd.s32 128, %v221_v13  ;;  %v582_v19 = vld [vmem:[#allocation5] sm:$0xff]  ;;  %s390_s30 = scalar_lea.sflag [#allocation4], %s955_s10  ;;  %s772_s5 = sshra.s32 %s405_s29, 4  ;;  %s773_s5 = int_to_ptr.hbm [resolvable:$true] %s772_s5 }
  0x35   : > { %363 = vmatpush.bf16.msra.mxu0 %v588_v2  ;;  %v591_v15 = vld [vmem:[#allocation5 + $0x48] sm:$0xff]  ;;  %v223_v16 = vld [vmem:[%s959_s23] sm:$0xff]  ;;  %s774_s19 = scalar_lea.hbm %s773_s5, 8  ;;  %s778_s18 = scalar_lea.hbm %s1008_s3, 16 }
  0x36   : > { %376 = vmatpush.bf16.msra.mxu1 %v596_v3  ;;  %v224_v18 = vld [vmem:[%s959_s23 + $0x8] sm:$0xff]  ;;  %v590_v20 = vld [vmem:[#allocation5 + $0x40] sm:$0xff]  ;;  %vm225_vm0 = vcmp.eq.s32.totalorder %v223_v16, %v221_v13  ;;  %p775_p1 = scmp.ne.s32.totalorder %s773_s5, %s774_s19  ;;  %p779_p12 = scmp.lt.s32.totalorder %s773_s5, %s1008_s3 }
  0x37   : > { %vm226_vm1 = vcmp.eq.s32.totalorder %v224_v18, %v222_v17  ;;  %vm573_vm2 = vmpackc.low %vm225_vm0, %vm225_vm0  ;;  %v265_v22 = vld [vmem:[#allocation7] sm:$0xff]  ;;  %p780_p7 = scmp.lt.s32.totalorder %s778_s18, %s774_s19 }
  0x38   : > { %vm575_vm3 = vmpackc.low %vm226_vm1, %vm226_vm1  ;;  %p776_p3 = pnand %p775_p1, %p924_p4 }
  0x39   : > { %364 = vmatpush.bf16.msra.mxu0 %v587_v4  ;;  %p781_p8 = por %p780_p7, %p779_p12 }
  0x3a   : > { %377 = vmatpush.bf16.msra.mxu1 %v595_v5  ;;  %p777_p5 = pneg %p776_p3 }
  0x3c   : > { %p782_p9 = pnand %p781_p8, %p777_p5 }
  0x3d   : > { %365 = vmatpush.bf16.msra.mxu0 %v586_v6 }
  0x3e   : > { %378 = vmatpush.bf16.msra.mxu1 %v594_v7 }
  0x41   : > { %366 = vmatpush.bf16.msra.mxu0 %v585_v8 }
  0x42   : > { %379 = vmatpush.bf16.msra.mxu1 %v593_v9 }
  0x45   : > { %367 = vmatpush.bf16.msra.mxu0 %v584_v11 }
  0x46   : > { %380 = vmatpush.bf16.msra.mxu1 %v592_v12 }
  0x49   : > { %368 = vmatpush.bf16.msra.mxu0 %v583_v14 }
  0x4a   : > { %381 = vmatpush.bf16.msra.mxu1 %v591_v15 }
  0x4d   : > { %369 = vmatpush.bf16.msra.mxu0 %v582_v19 }
  0x4e   : > { %382 = vmatpush.bf16.msra.mxu1 %v590_v20 }
  0x50   : > { %574 = vmatmul.msk.bf16.vlgmr.msra.gmra.mxu0 %vm573_vm2, %v834_v21 }
  0x51   : > { %576 = vmatmul.msk.bf16.vlgmr.msra.gmra.mxu1 %vm575_vm3, %v834_v21 }
  0xcd   : > { %v371_v23 = vpop.f32.mrf.mxu0 }
  0xce   : > { %v384_v24 = vpop.f32.mrf.mxu1  ;;  %v372_v25 = vadd.f32 %v371_v23, %v265_v22 }
  0xd0   : > { %v385_v26 = vadd.f32 %v384_v24, %v372_v25 }
  0xd2   : > { %388 = vst [vmem:[%s219_s27] sm:$0xff] %v385_v26 }
  0xd3   : > { %785 = shalt.err (!%p782_p9)
}
  0xd4   : > { %608 = dma.vmem_to_hbm [thread:$0]  (%p924_p4), %s403_s28, 128, %s405_s29, %s390_s30  }
  0xd5   : > { %v373_v27 = vpop.f32.mrf.mxu0 }
  0xd6   : > { %v386_v28 = vpop.f32.mrf.mxu1 }
  0xd7 PF: > { %s416_s10 = sand.u32 1, %s816_s12   ;;  %p1015_p10 = scmp.ge.s32.totalorder %s828_s15, 2 }
  0xd8   : > { %s417_s22 = scalar_lea.sflag [#allocation4], %s416_s10 }
  0xd9   : > { %p622_p13 = pnand %p1015_p10, %p928_p6 }
  0xdb   : > { %p623_p11 = pneg %p622_p13 }
  0xdd   : > { %811 = dma.done.wait (%p623_p11), %s417_s22, 128  }
  0xde   : > { %813 = vsyncadd (%p623_p11), %s417_s22, 4294967168  ;;  %p17_p4 = scmp.ge.s32.totalorder %s898_s4, 4   ;;  %s1016_s12 = smov %s820_s13 }
  0xdf   : > { %s1017_s13 = smov %s824_s14  ;;  %s1018_s14 = smov %s909_s7 }
  0xe0   : > { %s1019_s15 = smov %s898_s4  ;;  %19 = sbr.rel (!%p17_p4) target bundleno = 6 (0x6), region = 85 }
  0xe5   :  { %423 = vsyncpa [#allocation3], 1 }
  0xe6   :  { %425 = vsyncpa [#allocation3 + $0x1], 1 }
  0xe7   :  { %426 = vsyncpa [#allocation6], 1 }
  0xe8   :  { %427 = vsyncpa [#allocation4], 1 }
  0xe9   :  { %429 = vsyncpa [#allocation4 + $0x1], 1 }

</bundles_post_ra>
